<compile_context>
chip_gen: v6e
topology: v6e:2x2x1
jax: 0.10.0
libtpu: 0.0.40
codegen_flags: <defaults>
</compile_context>

<pallas_src>
import jax
import jax.numpy as jnp
from jax.experimental import pallas as pl
from jax.experimental.pallas import tpu as pltpu


def _cdiv(a, b):
    return (a + b - 1) // b


def _round_up(x, m):
    return ((x + m - 1) // m) * m


def _gtconv_wsum_kernel(sm_ref, a_ref, out_ref):
    # sm_ref : SMEM [C_out, C_in] f32   (softmaxed weights, grid-invariant)
    # a_ref  : VMEM [C_in,  BR, BC]     (dense slab of the adjacency stack)
    # out_ref: VMEM [C_out, BR, BC] f32
    c_in = a_ref.shape[0]
    c_out = out_ref.shape[0]
    # Output-major loop: exactly one accumulator slab is live at a time, so
    # there are no vreg spills even for large blocks.  The A slabs are
    # re-read from VMEM for each output channel; VMEM has 3 vld slots/cycle
    # and the kernel is HBM-bound after the dense-slab layout fix, so the
    # re-reads are free, whereas keeping C_out slab accumulators live
    # (channel-major order) would spill through the single vst slot.
    for o in range(c_out):
        acc = sm_ref[o, 0] * a_ref[0].astype(jnp.float32)
        for c in range(1, c_in):
            acc = acc + sm_ref[o, c] * a_ref[c].astype(jnp.float32)
        out_ref[o] = acc.astype(out_ref.dtype)


def _derive_blocks(c_in, c_out, n, budget_bytes):
    """Pick (BR, BC) blocks of the N x N adjacency within a VMEM budget."""
    # Lane (last-dim) block: multiple of 128, or the full dim when N < 128.
    if n >= 128:
        bc = min((n // 128) * 128, 1024)
    else:
        bc = n
    # Sublane (second-to-last dim) block: multiple of 8 within the
    # double-buffered VMEM budget (A block + output block, x2 buffers, f32).
    per_row_bytes = 2 * (c_in + c_out) * bc * 4
    max_rows = max(budget_bytes // per_row_bytes, 1)
    if n >= 8:
        br = min((n // 8) * 8, (max_rows // 8) * 8)
        br = max(br, 8)
    else:
        br = n
    # Guarantee >= 2 grid steps so dimension_semantics="parallel" actually
    # shards across v7x's two TensorCores (no effect on v5e/v6e single TC).
    if _cdiv(n, br) * _cdiv(n, bc) < 2 and n > 8:
        br = max(8, min(br, _round_up(_cdiv(n, 2), 8)))
    return br, bc


def gtconv_forward(weight, a_dense, *, block_rows=None, block_cols=None,
                   vmem_budget_bytes=24 * 1024 * 1024):
    """weight: [C_out, C_in]; a_dense: [C_in, N, N] (densified adjacency stack).

    Returns (out [C_out, N, N] f32, softmax_weight [C_out, C_in] f32).
    """
    c_out, c_in = weight.shape
    c_in_a, n, n2 = a_dense.shape
    assert c_in_a == c_in and n == n2

    # Row softmax of the tiny weight matrix (also the module's second output).
    # Done in the wrapper: a dedicated Pallas launch would cost more than the
    # handful of exp/sum ops it replaces.
    sw = jax.nn.softmax(weight.astype(jnp.float32), axis=1)

    br, bc = _derive_blocks(c_in, c_out, n, vmem_budget_bytes)
    if block_rows is not None:
        br = block_rows
    if block_cols is not None:
        bc = block_cols

    grid = (_cdiv(n, br), _cdiv(n, bc))

    # Double-buffered block footprint; keep the explicit limit modest so it is
    # legal on v7x (64 MiB physical) while exceeding v5e's 16 MiB default.
    footprint = 2 * (c_in + c_out) * br * bc * 4
    vmem_limit_bytes = int(min(48 << 20, max(32 << 20, 2 * footprint)))

    out = pl.pallas_call(
        _gtconv_wsum_kernel,
        out_shape=jax.ShapeDtypeStruct((c_out, n, n), jnp.float32),
        grid_spec=pltpu.PrefetchScalarGridSpec(
            num_scalar_prefetch=0,
            grid=grid,
            in_specs=[
                # Softmaxed weights: whole array in SMEM, read as scalars.
                pl.BlockSpec(memory_space=pltpu.MemorySpace.SMEM),
                # Adjacency stack: dense [C_in, BR, BC] slab per grid step,
                # auto double-buffered by the BlockSpec pipeline.
                pl.BlockSpec((c_in, br, bc), lambda i, j: (0, i, j)),
            ],
            out_specs=pl.BlockSpec((c_out, br, bc), lambda i, j: (0, i, j)),
        ),
        compiler_params=pltpu.CompilerParams(
            dimension_semantics=("parallel", "parallel"),
            vmem_limit_bytes=vmem_limit_bytes,
        ),
    )(sw, a_dense)

    return out, sw


def xavier_uniform(key, shape):
    # nn.init.xavier_uniform_ for a 2-D (out, in) tensor: U(-b, b),
    # b = sqrt(6 / (fan_in + fan_out)).
    fan_out, fan_in = shape
    bound = (6.0 / (fan_in + fan_out)) ** 0.5
    return jax.random.uniform(key, shape, jnp.float32, -bound, bound)


def _make_inputs(key, in_channels, out_channels, num_nodes, sparsity=0.7):
    k_w, k_vals, k_mask = jax.random.split(key, 3)
    weight = xavier_uniform(k_w, (out_channels, in_channels))
    # Deterministic "sparse" adjacency stack stored dense (== coalesced COO).
    vals = jax.random.uniform(
        k_vals, (in_channels, num_nodes, num_nodes), jnp.float32)
    mask = jax.random.uniform(
        k_mask, (in_channels, num_nodes, num_nodes)) < (1.0 - sparsity)
    a_dense = jnp.where(mask, vals, 0.0).astype(jnp.float32)
    return weight, a_dense


def _check(weight, a_dense, **kw):
    out, sw = gtconv_forward(weight, a_dense, **kw)
    out = jax.block_until_ready(out)
    sw = jax.block_until_ready(sw)
    sm_ref = jax.nn.softmax(weight, axis=1)
    out_ref = jnp.einsum("oc,cnm->onm", sm_ref, a_dense)
    assert jnp.allclose(sw, sm_ref, atol=1e-5), "softmax mismatch"
    assert jnp.allclose(out, out_ref, atol=1e-4), "weighted-sum mismatch"


if __name__ == "__main__":
    key = jax.random.PRNGKey(0)
    k1, k2, k3 = jax.random.split(key, 3)

    # Config matching the module defaults: GTConv(in_channels=4,
    # out_channels=2, num_nodes=16).  Derived blocks give a (2, 1) grid
    # (row-split so the pipelined multi-step path is exercised).
    w1, a1 = _make_inputs(k1, in_channels=4, out_channels=2, num_nodes=16)
    _check(w1, a1)

    # Non-multiple-of-8 node count: N = 18 -> (16, 18) blocks, ragged last
    # row block handled by Pallas partial-block read / masked writeback.
    w2, a2 = _make_inputs(k2, in_channels=3, out_channels=2, num_nodes=18)
    _check(w2, a2)

    # Lane-tiled path: N = 160 -> BC = 128 with a ragged last lane block.
    w3, a3 = _make_inputs(k3, in_channels=3, out_channels=2, num_nodes=160)
    _check(w3, a3)

    print("KERNEL_OK")
</pallas_src>

<mosaic_0001>
module attributes {stable_mosaic.version = 11 : i64} {
  func.func @_gtconv_wsum_kernel(%arg0: i32, %arg1: i32, %arg2: memref<2x4xf32, #tpu.memory_space<smem>>, %arg3: memref<4x8x16xf32, #tpu.memory_space<vmem>>, %arg4: memref<2x8x16xf32, #tpu.memory_space<vmem>>) attributes {dimension_semantics = [#tpu.dimension_semantics<parallel>, #tpu.dimension_semantics<parallel>], iteration_bounds = array<i64: 2, 1>, scalar_prefetch = 0 : i64, scratch_operands = 0 : i64, tpu.core_type = #tpu.core_type<tc>, window_params = [{transform_indices = @transform_0, window_bounds = array<i64: 2, 4>}, {transform_indices = @transform_1, window_bounds = array<i64: 4, 8, 16>}, {transform_indices = @transform_2, window_bounds = array<i64: 2, 8, 16>}]} {
    %c0 = arith.constant 0 : index
    %c0_0 = arith.constant 0 : index
    %0 = memref.load %arg2[%c0, %c0_0] : memref<2x4xf32, #tpu.memory_space<smem>>
    %c0_1 = arith.constant 0 : index
    %c0_2 = arith.constant 0 : index
    %c0_3 = arith.constant 0 : index
    %1 = vector.load %arg3[%c0_1, %c0_2, %c0_3] : memref<4x8x16xf32, #tpu.memory_space<vmem>>, vector<1x8x16xf32>
    %2 = vector.shape_cast %1 : vector<1x8x16xf32> to vector<8x16xf32>
    %3 = vector.broadcast %0 : f32 to vector<8x16xf32>
    %4 = arith.mulf %3, %2 : vector<8x16xf32>
    %c0_4 = arith.constant 0 : index
    %c1 = arith.constant 1 : index
    %5 = memref.load %arg2[%c0_4, %c1] : memref<2x4xf32, #tpu.memory_space<smem>>
    %c1_5 = arith.constant 1 : index
    %c0_6 = arith.constant 0 : index
    %c0_7 = arith.constant 0 : index
    %6 = vector.load %arg3[%c1_5, %c0_6, %c0_7] : memref<4x8x16xf32, #tpu.memory_space<vmem>>, vector<1x8x16xf32>
    %7 = vector.shape_cast %6 : vector<1x8x16xf32> to vector<8x16xf32>
    %8 = vector.broadcast %5 : f32 to vector<8x16xf32>
    %9 = arith.mulf %8, %7 : vector<8x16xf32>
    %10 = arith.addf %4, %9 : vector<8x16xf32>
    %c0_8 = arith.constant 0 : index
    %c2 = arith.constant 2 : index
    %11 = memref.load %arg2[%c0_8, %c2] : memref<2x4xf32, #tpu.memory_space<smem>>
    %c2_9 = arith.constant 2 : index
    %c0_10 = arith.constant 0 : index
    %c0_11 = arith.constant 0 : index
    %12 = vector.load %arg3[%c2_9, %c0_10, %c0_11] : memref<4x8x16xf32, #tpu.memory_space<vmem>>, vector<1x8x16xf32>
    %13 = vector.shape_cast %12 : vector<1x8x16xf32> to vector<8x16xf32>
    %14 = vector.broadcast %11 : f32 to vector<8x16xf32>
    %15 = arith.mulf %14, %13 : vector<8x16xf32>
    %16 = arith.addf %10, %15 : vector<8x16xf32>
    %c0_12 = arith.constant 0 : index
    %c3 = arith.constant 3 : index
    %17 = memref.load %arg2[%c0_12, %c3] : memref<2x4xf32, #tpu.memory_space<smem>>
    %c3_13 = arith.constant 3 : index
    %c0_14 = arith.constant 0 : index
    %c0_15 = arith.constant 0 : index
    %18 = vector.load %arg3[%c3_13, %c0_14, %c0_15] : memref<4x8x16xf32, #tpu.memory_space<vmem>>, vector<1x8x16xf32>
    %19 = vector.shape_cast %18 : vector<1x8x16xf32> to vector<8x16xf32>
    %20 = vector.broadcast %17 : f32 to vector<8x16xf32>
    %21 = arith.mulf %20, %19 : vector<8x16xf32>
    %22 = arith.addf %16, %21 : vector<8x16xf32>
    %c0_16 = arith.constant 0 : index
    %c0_17 = arith.constant 0 : index
    %c0_18 = arith.constant 0 : index
    %23 = vector.load %arg4[%c0_16, %c0_17, %c0_18] : memref<2x8x16xf32, #tpu.memory_space<vmem>>, vector<1x8x16xf32>
    %24 = vector.shape_cast %23 : vector<1x8x16xf32> to vector<8x16xf32>
    %25 = vector.shape_cast %22 : vector<8x16xf32> to vector<1x8x16xf32>
    tpu.vector_store %arg4[%c0_16, %c0_17, %c0_18], %25 {strides = array<i32>} : memref<2x8x16xf32, #tpu.memory_space<vmem>>, vector<1x8x16xf32>,
    %c1_19 = arith.constant 1 : index
    %c0_20 = arith.constant 0 : index
    %26 = memref.load %arg2[%c1_19, %c0_20] : memref<2x4xf32, #tpu.memory_space<smem>>
    %c0_21 = arith.constant 0 : index
    %c0_22 = arith.constant 0 : index
    %c0_23 = arith.constant 0 : index
    %27 = vector.load %arg3[%c0_21, %c0_22, %c0_23] : memref<4x8x16xf32, #tpu.memory_space<vmem>>, vector<1x8x16xf32>
    %28 = vector.shape_cast %27 : vector<1x8x16xf32> to vector<8x16xf32>
    %29 = vector.broadcast %26 : f32 to vector<8x16xf32>
    %30 = arith.mulf %29, %28 : vector<8x16xf32>
    %c1_24 = arith.constant 1 : index
    %c1_25 = arith.constant 1 : index
    %31 = memref.load %arg2[%c1_24, %c1_25] : memref<2x4xf32, #tpu.memory_space<smem>>
    %c1_26 = arith.constant 1 : index
    %c0_27 = arith.constant 0 : index
    %c0_28 = arith.constant 0 : index
    %32 = vector.load %arg3[%c1_26, %c0_27, %c0_28] : memref<4x8x16xf32, #tpu.memory_space<vmem>>, vector<1x8x16xf32>
    %33 = vector.shape_cast %32 : vector<1x8x16xf32> to vector<8x16xf32>
    %34 = vector.broadcast %31 : f32 to vector<8x16xf32>
    %35 = arith.mulf %34, %33 : vector<8x16xf32>
    %36 = arith.addf %30, %35 : vector<8x16xf32>
    %c1_29 = arith.constant 1 : index
    %c2_30 = arith.constant 2 : index
    %37 = memref.load %arg2[%c1_29, %c2_30] : memref<2x4xf32, #tpu.memory_space<smem>>
    %c2_31 = arith.constant 2 : index
    %c0_32 = arith.constant 0 : index
    %c0_33 = arith.constant 0 : index
    %38 = vector.load %arg3[%c2_31, %c0_32, %c0_33] : memref<4x8x16xf32, #tpu.memory_space<vmem>>, vector<1x8x16xf32>
    %39 = vector.shape_cast %38 : vector<1x8x16xf32> to vector<8x16xf32>
    %40 = vector.broadcast %37 : f32 to vector<8x16xf32>
    %41 = arith.mulf %40, %39 : vector<8x16xf32>
    %42 = arith.addf %36, %41 : vector<8x16xf32>
    %c1_34 = arith.constant 1 : index
    %c3_35 = arith.constant 3 : index
    %43 = memref.load %arg2[%c1_34, %c3_35] : memref<2x4xf32, #tpu.memory_space<smem>>
    %c3_36 = arith.constant 3 : index
    %c0_37 = arith.constant 0 : index
    %c0_38 = arith.constant 0 : index
    %44 = vector.load %arg3[%c3_36, %c0_37, %c0_38] : memref<4x8x16xf32, #tpu.memory_space<vmem>>, vector<1x8x16xf32>
    %45 = vector.shape_cast %44 : vector<1x8x16xf32> to vector<8x16xf32>
    %46 = vector.broadcast %43 : f32 to vector<8x16xf32>
    %47 = arith.mulf %46, %45 : vector<8x16xf32>
    %48 = arith.addf %42, %47 : vector<8x16xf32>
    %c1_39 = arith.constant 1 : index
    %c0_40 = arith.constant 0 : index
    %c0_41 = arith.constant 0 : index
    %49 = vector.load %arg4[%c1_39, %c0_40, %c0_41] : memref<2x8x16xf32, #tpu.memory_space<vmem>>, vector<1x8x16xf32>
    %50 = vector.shape_cast %49 : vector<1x8x16xf32> to vector<8x16xf32>
    %51 = vector.shape_cast %48 : vector<8x16xf32> to vector<1x8x16xf32>
    tpu.vector_store %arg4[%c1_39, %c0_40, %c0_41], %51 {strides = array<i32>} : memref<2x8x16xf32, #tpu.memory_space<vmem>>, vector<1x8x16xf32>,
    return
  }
  func.func @transform_0(%arg0: i32, %arg1: i32) -> (i32, i32) {
    %c0_i32 = arith.constant 0 : i32
    %c0_i32_0 = arith.constant 0 : i32
    %c0_i32_1 = arith.constant 0 : i32
    return %c0_i32, %c0_i32_0 : i32, i32
  }
  func.func @transform_1(%arg0: i32, %arg1: i32) -> (i32, i32, i32) {
    %c0_i32 = arith.constant 0 : i32
    %c0_i32_0 = arith.constant 0 : i32
    return %c0_i32, %arg0, %arg1 : i32, i32, i32
  }
  func.func @transform_2(%arg0: i32, %arg1: i32) -> (i32, i32, i32) {
    %c0_i32 = arith.constant 0 : i32
    %c0_i32_0 = arith.constant 0 : i32
    return %c0_i32, %arg0, %arg1 : i32, i32, i32
  }
}

</mosaic_0001>

<bundles_post_ra>
// kernel: tpu_custom_call.1
= control target key start
LH: loop header
LB: loop body
LE: loop exit
PB: predicated region body
PF: predicated region fallthrough
CT: control target
= control target key end

     0   :  { %s765_s0 = inlined_call_operand.hbm [shape: f32[2,4], index: 0, kind: input, shape index: {}]   ;;  %s766_s1 = inlined_call_operand.hbm [shape: f32[4,16,16], index: 1, kind: input, shape index: {}]   ;;  %s767_s2 = inlined_call_operand.hbm [shape: f32[2,16,16], index: 2, kind: output, shape index: {}]  }
   0x1   :  { %768 = sst [smem:[#allocation11_spill]] %s765_s0 }
   0x2   :  { %7 = vsyncpa [#allocation5], 0 }
   0x3   :  { %8 = vsyncpa [#allocation3], 0 }
   0x4   :  { %10 = vsyncpa [#allocation3 + $0x1], 0 }
   0x5   :  { %11 = vsyncpa [#allocation4], 0 }
   0x6   :  { %13 = vsyncpa [#allocation4 + $0x1], 0  ;;  %s601_s9 = smov 0   ;;  %s603_s10 = smov 0  }
   0x7   :  { %s605_s11 = smov 0   ;;  %s607_s12 = smov 0  }
   0x8   :  { %s609_s13 = smov 0   ;;  %s611_s14 = smov 0  }
   0x9 LB: > { %s344_s15 = sadd.s32 4294967295, %s575_s14   ;;  %s345_s16 = sadd.s32 4294967294, %s575_s14   ;;  %s575_s14 = sphi %s611_s14, %s19_s14   ;;  %s571_s13 = sphi %s609_s13, %s782_s13   ;;  %s567_s12 = sphi %s607_s12, %s781_s12   ;;  %s563_s11 = sphi %s605_s11, %s780_s11   ;;  %s559_s10 = sphi %s603_s10, %s779_s10   ;;  %s555_s9 = sphi %s601_s9, %s778_s9  }
   0xa   : > { %s61_s17 = sadd.s32 1, %s563_s11  ;;  %p68_p0 = scmp.ne.s32.totalorder %s563_s11, %s559_s10 }
   0xb   : > { %p69_p1 = scmp.eq.s32.totalorder %s575_s14, 0  ;;  %p74_p2 = scmp.ne.s32.totalorder %s559_s10, %s555_s9 }
   0xc   : > { %p639_p3 = scmp.eq.s32.totalorder %s344_s15, 0  ;;  %p100_p4 = scmp.eq.s32.totalorder %s344_s15, 1 }
   0xd   : > { %p70_p5 = por %p69_p1, %p68_p0  ;;  %p106_p6 = scmp.eq.s32.totalorder %s345_s16, 1 }
   0xe   : > { %p645_p7 = por %p639_p3, %p74_p2  ;;  %p649_p8 = por %p100_p4, %p68_p0 }
   0xf   : > { %p653_p9 = por %p106_p6, %p74_p2  ;;  %p346_p10 = scmp.ge.s32.totalorder %s575_s14, 1 }
  0x10   : > { %p113_p11 = scmp.lt.s32.totalorder %s575_s14, 3  ;;  %p394_p1 = scmp.lt.s32.totalorder %s575_s14, 2 }
  0x11   : > { %s772_s21 = scalar_select %p653_p9, 1, 0 }
  0x12   : > { %p660_p13 = pnand %p346_p10, %p113_p11  ;;  %s135_s23 = sand.u32 1, %s563_s11  }
  0x13   : > { %p668_p2 = pnand %p394_p1, %p70_p5  ;;  %s31_s25 = sadd.s32 1, %s571_s13 }
  0x14   : > { %p381_p0 = pneg %p660_p13  ;;  %s349_s26 = sshll.u32 %s135_s23, 5 }
  0x15   : > { %p33_p6 = scmp.ge.s32.totalorder %s31_s25, 2  ;;  %s577_s27 = smov [#allocation2]  }
  0x16   : > { %p382_p4 = pnand %p381_p0, %p639_p3  ;;  %s775_s0 = sld [smem:[#allocation11_spill]] }
  0x17   : > { %s784_s25 = smov (%p33_p6, %s31_s25), 0  ;;  %s350_s30 = sshll.u32 %s571_s13, 7 }
  0x18   : > { %s56_s3 = ssub.s32 %s571_s13, %s784_s25  ;;  %s145_s6 = scalar_lea.hbm %s766_s1, %s350_s30 }
  0x19   : > { %p59_p5 = scmp.eq.s32.totalorder %s56_s3, 0  ;;  %s139_s7 = scalar_lea.vmem [#allocation6], %s349_s26 }
  0x1a   : > { %s146_s8 = sshll.u32 %s139_s7, 4  ;;  %s136_s16 = scalar_lea.sflag [#allocation3], %s135_s23  ;;  %s147_s8 = int_to_ptr.vmem [resolvable:$true] %s146_s8 }
  0x1b   : > { %s689_s15 = scalar_select %p59_p5, %s563_s11, %s61_s17  }
  0x1c   : > { %384 = dma.hbm_to_smem (!%p382_p4), %s775_s0, 32, %s577_s27, [#allocation5]  }
  0x1d   : > { %p465_p10 = pneg %p668_p2  ;;  %s476_s27 = scalar_lea.vmem %s147_s8, 512 }
  0x1e   : > { %p477_p11 = scmp.ne.s32.totalorder %s147_s8, %s476_s27  ;;  %s578_s28 = smov [#allocation6]  }
  0x1f   : > { %s481_s29 = sshll.u32 %s578_s28, 4  ;;  %s482_s29 = int_to_ptr.vmem [resolvable:$false] %s481_s29 }
  0x20   : > { %p479_p1 = pnand %p477_p11, %p465_p10  ;;  %s483_s0 = scalar_lea.vmem %s482_s29, 1024 }
  0x21   : > { %p484_p4 = scmp.lt.s32.totalorder %s147_s8, %s482_s29  ;;  %p485_p6 = scmp.lt.s32.totalorder %s483_s0, %s476_s27 }
  0x22   : > { %p480_p0 = pneg %p479_p1 }
  0x23   : > { %p486_p12 = por %p485_p6, %p484_p4 }
  0x25   : > { %p487_p9 = pnand %p486_p12, %p480_p0 }
  0x27   : > { %490 = shalt.err (!%p487_p9)
}
  0x28   : > { %s579_s26 = smov 256   ;;  %s580_s17 = smov 128  }
  0x29   : > { %s581_s30 = smov 8   ;;  %158 = sbr.rel (%p660_p13) target bundleno = 88 (0x58), region = 28 }
  0x2a   : > { %388 = dma.hbm_to_vmem [thread:$0]  (!%p668_p2), %s145_s6, 512, %s147_s8, %s136_s16, %s579_s26, %s580_s17, %s581_s30  }
  0x2e   : > { %542 = dma.done.wait (%p639_p3), [#allocation5], 32  }
  0x2f   : > { %544 = vsyncadd (%p639_p3), [#allocation5], 4294967264  ;;  %s702_s0 = sand.u32 1, %s559_s10  }
  0x30   : > { %s353_s23 = sshll.u32 %s702_s0, 5  ;;  %s165_s3 = scalar_lea.sflag [#allocation3], %s702_s0 }
  0x31   : > { %s168_s4 = scalar_lea.vmem [#allocation6], %s353_s23 }
  0x32   : > { %546 = dma.done.wait (%p645_p7), %s165_s3, 512  }
  0x33   : > { %548 = vsyncadd (%p645_p7), %s165_s3, 4294966784 }
  0x34   : > { %173 = sfence }
  0x35   : > { %s190_s22 = sld [smem:[#allocation2]]  ;;  %v191_v0 = vld [vmem:[%s168_s4] sm:$0xff]  ;;  %v356_v1 = vld [vmem:[%s168_s4 + $0x8] sm:$0xff]  ;;  %v358_v3 = vld [vmem:[%s168_s4 + $0x10] sm:$0xff]  ;;  %s354_s16 = sshll.u32 %s702_s0, 4  ;;  %vm212_vm0 = vcmask 130048  }
  0x36   : > { %s355_s24 = sld [smem:[#allocation2 + $0x1]]  ;;  %v360_v6 = vld [vmem:[%s168_s4 + $0x18] sm:$0xff]  ;;  %s189_s19 = scalar_lea.vmem [#allocation7], %s354_s16 }
  0x37   : > { %s357_s18 = sld [smem:[#allocation2 + $0x2]]  ;;  %s249_s28 = sshll.u32 %s189_s19, 4  ;;  %s712_s28 = int_to_ptr.vmem [resolvable:$true] %s249_s28 }
  0x38   : > { %s359_s5 = sld [smem:[#allocation2 + $0x3]]  ;;  %s370_s29 = sshll.u32 %s567_s12, 7 }
  0x39   : > { %s361_s6 = sld [smem:[#allocation2 + $0x80]]  ;;  %s717_s30 = scalar_lea.hbm %s767_s2, %s370_s29 }
  0x3a   : > { %s362_s7 = sld [smem:[#allocation2 + $0x81]]  ;;  %s236_s23 = scalar_lea.sflag [#allocation4], %s702_s0 }
  0x3b   : > { %v192_v2 = vstv %s190_s22  ;;  %s364_s8 = sld [smem:[#allocation2 + $0x82]]  ;;  %s491_s3 = scalar_lea.vmem %s712_s28, 256 }
  0x3c   : > { %v193_v4 = vmul.f32 %v192_v2, %v191_v0  ;;  %v197_v5 = vstv %s355_s24  ;;  %s366_s27 = sld [smem:[#allocation2 + $0x83]]  ;;  %p492_p3 = scmp.ne.s32.totalorder %s712_s28, %s491_s3 }
  0x3d   : > { %v198_v7 = vmul.f32 %v356_v1, %v197_v5  ;;  %v203_v8 = vstv %s357_s18  ;;  %s582_s12 = smov [#allocation7]  }
  0x3e   : > { %v204_v9 = vmul.f32 %v358_v3, %v203_v8  ;;  %v209_v10 = vstv %s359_s5  ;;  %p493_p7 = pnand %p492_p3, %p649_p8  ;;  %s495_s4 = sshll.u32 %s582_s12, 4  ;;  %s496_s4 = int_to_ptr.vmem [resolvable:$false] %s495_s4 }
  0x3f   : > { %v199_v11 = vadd.f32 %v198_v7, %v193_v4  ;;  %v210_v12 = vmul.f32 %v360_v6, %v209_v10  ;;  %v216_v13 = vstv %s361_s6  ;;  %s497_s22 = scalar_lea.vmem %s496_s4, 512  ;;  %p498_p12 = scmp.lt.s32.totalorder %s712_s28, %s496_s4 }
  0x40   : > { %v217_v14 = vmul.f32 %v216_v13, %v191_v0  ;;  %v220_v15 = vstv %s362_s7  ;;  %p494_p9 = pneg %p493_p7  ;;  %p499_p13 = scmp.lt.s32.totalorder %s497_s22, %s491_s3 }
  0x41   : > { %v205_v16 = vadd.f32 %v204_v9, %v199_v11  ;;  %v221_v17 = vmul.f32 %v356_v1, %v220_v15  ;;  %v225_v18 = vstv %s364_s8 }
  0x42   : > { %v226_v19 = vmul.f32 %v358_v3, %v225_v18  ;;  %v230_v20 = vstv %s366_s27  ;;  %p500_p2 = por %p499_p13, %p498_p12 }
  0x43   : > { %v211_v21 = vadd.f32 %v210_v12, %v205_v16  ;;  %v222_v22 = vadd.f32 %v221_v17, %v217_v14  ;;  %v231_v23 = vmul.f32 %v360_v6, %v230_v20 }
  0x44   : > { %p501_p5 = pnand %p500_p2, %p494_p9 }
  0x45   : > { %213 = vst.msk [vmem:[%s189_s19] sm:$0xff] %vm212_vm0, %v211_v21  ;;  %v227_v24 = vadd.f32 %v226_v19, %v222_v22 }
  0x47   : > { %v232_v25 = vadd.f32 %v231_v23, %v227_v24 }
  0x49   : > { %368 = vst.msk [vmem:[%s189_s19 + $0x8] sm:$0xff] %vm212_vm0, %v232_v25 }
  0x4a   : > { %504 = shalt.err (!%p501_p5)
}
  0x4b   : > { %s505_s24 = scalar_lea.hbm %s717_s30, 256  ;;  %s509_s6 = scalar_lea.hbm %s767_s2, 512 }
  0x4c   : > { %p506_p10 = scmp.ne.s32.totalorder %s717_s30, %s505_s24  ;;  %p510_p0 = scmp.lt.s32.totalorder %s717_s30, %s767_s2 }
  0x4d   : > { %p511_p4 = scmp.lt.s32.totalorder %s509_s6, %s505_s24 }
  0x4e   : > { %p507_p11 = pnand %p506_p10, %p649_p8 }
  0x4f   : > { %p512_p6 = por %p511_p4, %p510_p0 }
  0x50   : > { %p508_p1 = pneg %p507_p11 }
  0x52   : > { %p513_p3 = pnand %p512_p6, %p508_p1 }
  0x54   : > { %516 = shalt.err (!%p513_p3)
}
  0x55   : > { %s583_s16 = smov 128   ;;  %s584_s27 = smov 256  }
  0x56   : > { %s585_s19 = smov 8  }
  0x57   : > { %379 = dma.vmem_to_hbm [thread:$0]  (%p649_p8), %s712_s28, 256, %s717_s30, %s236_s23, %s583_s16, %s584_s27, %s585_s19  }
  0x58 PF: > { %s264_s29 = sand.u32 1, %s555_s9   ;;  %p776_p7 = scmp.ne.s32.totalorder %s772_s21, 0 }
  0x59   : > { %p777_p9 = scmp.ge.s32.totalorder %s575_s14, 2  ;;  %s265_s26 = scalar_lea.sflag [#allocation4], %s264_s29 }
  0x5b   : > { %p390_p12 = pnand %p777_p9, %p776_p7 }
  0x5d   : > { %p391_p13 = pneg %p390_p12 }
  0x5f   : > { %550 = dma.done.wait (%p391_p13), %s265_s26, 256  }
  0x60   : > { %552 = vsyncadd (%p391_p13), %s265_s26, 4294967040  ;;  %s19_s14 = sadd.s32 1, %s575_s14   ;;  %s778_s9 = smov %s559_s10 }
  0x61   : > { %p16_p2 = scmp.ge.s32.totalorder %s19_s14, 4   ;;  %s779_s10 = smov %s563_s11 }
  0x62   : > { %s780_s11 = smov %s689_s15  ;;  %s781_s12 = smov %s571_s13 }
  0x63   : > { %s782_s13 = smov %s784_s25  ;;  %18 = sbr.rel (!%p16_p2) target bundleno = 9 (0x9), region = 82 }
  0x68   :  { %270 = vsyncpa [#allocation3], 1 }
  0x69   :  { %272 = vsyncpa [#allocation3 + $0x1], 1 }
  0x6a   :  { %273 = vsyncpa [#allocation4], 1 }
  0x6b   :  { %275 = vsyncpa [#allocation4 + $0x1], 1 }
  0x6c   :  { %276 = vsyncpa [#allocation5], 1 }
  0x6d   :  { %278 = vsyncpa [#allocation5 + $0x1], 1 }

</bundles_post_ra>
